<compile_context>
chip_gen: v7x
topology: tpu7x:2x2x1
jax: 0.10.0
libtpu: 0.0.40
codegen_flags: <defaults>
</compile_context>

<pallas_src>
import functools

import numpy as np
import jax
import jax.numpy as jnp
from jax import lax
from jax.experimental import pallas as pl
from jax.experimental.pallas import tpu as pltpu


def _round_up(x, m):
    return (x + m - 1) // m * m


def _basic_conv_kernel(x_ref, w_ref, shift_ref, o_ref, *, apply_relu):
    # x_ref:     (1, Kpad, T)   bf16 im2col tile, spatial (Ho*Wo) on lanes
    # w_ref:     (Coutp, Kpad)  bf16 weight, BN scale pre-folded
    # shift_ref: (Coutp, 1)     f32 folded BN shift (+ conv bias)
    # o_ref:     (1, Coutp, T)  output tile, already channel-major (NCHW)
    acc = jnp.dot(w_ref[...], x_ref[0],
                  preferred_element_type=jnp.float32)      # single MXU push
    y = acc + shift_ref[...]                                # BN shift (f32)
    if apply_relu:
        y = jnp.maximum(y, 0.0)                             # ReLU
    o_ref[0] = y.astype(o_ref.dtype)


def _physical_vmem_bytes():
    try:
        return int(pltpu.get_tpu_info().vmem_capacity_bytes)
    except Exception:
        return 64 * 1024 * 1024     # conservative fallback (= v7x per-TC VMEM)


def _pick_lane_tile(howo, kpad, coutp, out_bytes, vmem_bytes):
    """Largest 128-multiple lane tile whose double-buffered footprint fits ~40% VMEM."""
    budget = int(0.40 * vmem_bytes)
    fixed = 2 * coutp * kpad * 2 + 2 * coutp * 128 * 4      # weight + shift buffers
    per_lane = 2 * (kpad * 2 + coutp * out_bytes)           # dbl-buffered in + out tiles
    cap = max(128, (budget - fixed) // per_lane)
    cap = min(cap, 8192)                                    # diminishing returns beyond this
    cap = (cap // 128) * 128
    return max(128, min(_round_up(howo, 128), cap))


def basic_conv_pallas(x_nchw, weight_oihw, gamma, beta, running_mean,
                      running_var, *, bias=None, stride=1, padding=0,
                      dilation=1, groups=1, eps=1e-5, relu=True, bn=True,
                      out_dtype=jnp.bfloat16):
    """Forward pass of BasicConv.  x_nchw: (N, Cin, H, W)."""
    assert dilation == 1, "TODO(synk): dilation != 1 not implemented"
    assert groups == 1, "TODO(synk): groups != 1 not implemented"

    N, Cin, H, W = x_nchw.shape
    Cout, _, KH, KW = weight_oihw.shape

    # ---------------- BN / bias fold (plain JAX, tiny) ------------------------
    if bn:
        scale = (gamma / jnp.sqrt(running_var + eps)).astype(jnp.float32)
        shift = (beta - running_mean * scale).astype(jnp.float32)
    else:
        scale = jnp.ones((Cout,), jnp.float32)
        shift = jnp.zeros((Cout,), jnp.float32)
    if bias is not None:
        shift = shift + scale * bias.astype(jnp.float32)

    Kdim = KH * KW * Cin
    Kpad = _round_up(Kdim, 16)        # dense bf16 sublane packing
    Coutp = _round_up(Cout, 8)

    # Weight: (Cout, Cin, KH, KW) -> (Cout, K) in (kh, kw, ci) order, BN scale folded.
    w2 = jnp.transpose(weight_oihw, (0, 2, 3, 1)).reshape(Cout, Kdim)
    w2 = w2 * scale[:, None]
    w2 = jnp.pad(w2, ((0, Coutp - Cout), (0, Kpad - Kdim))).astype(jnp.bfloat16)
    shift2 = jnp.pad(shift, (0, Coutp - Cout)).reshape(Coutp, 1).astype(jnp.float32)

    # ---------------- im2col, bf16 end-to-end ---------------------------------
    # Cast BEFORE pad / tap slicing so all XLA-side intermediates are bf16.
    x_bf = x_nchw.astype(jnp.bfloat16)
    x_pad = jnp.pad(x_bf, ((0, 0), (0, 0), (padding, padding), (padding, padding)))
    Hp, Wp = H + 2 * padding, W + 2 * padding
    Ho = (Hp - KH) // stride + 1
    Wo = (Wp - KW) // stride + 1
    HoWo = Ho * Wo
    taps = []
    for kh in range(KH):
        for kw in range(KW):
            taps.append(x_pad[:, :, kh::stride, kw::stride][:, :, :Ho, :Wo])
    # patches[n, (kh*KW+kw)*Cin + ci, ho*Wo + wo]
    patches = jnp.stack(taps, axis=1).reshape(N, Kdim, HoWo)

    # ---------------- lane-dense padding + VMEM-derived tile ------------------
    out_bytes = np.dtype(out_dtype).itemsize
    vmem_bytes = _physical_vmem_bytes()
    tile = _pick_lane_tile(HoWo, Kpad, Coutp, out_bytes, vmem_bytes)
    S_pad = _round_up(HoWo, tile)                     # multiple of 128 -> unmasked vst
    patches = jnp.pad(patches, ((0, 0), (0, Kpad - Kdim), (0, S_pad - HoWo)))

    fixed = 2 * Coutp * Kpad * 2 + 2 * Coutp * 128 * 4
    per_lane = 2 * (Kpad * 2 + Coutp * out_bytes)
    footprint = fixed + per_lane * tile
    vmem_limit = min(int(0.9 * vmem_bytes), max(footprint + (4 << 20), 32 << 20))

    # ---------------- Pallas call ----------------------------------------------
    out = pl.pallas_call(
        functools.partial(_basic_conv_kernel, apply_relu=relu),
        out_shape=jax.ShapeDtypeStruct((N, Coutp, S_pad), out_dtype),
        grid_spec=pltpu.PrefetchScalarGridSpec(
            num_scalar_prefetch=0,
            grid=(N, S_pad // tile),
            in_specs=[
                pl.BlockSpec((1, Kpad, tile), lambda n, s: (n, 0, s)),
                pl.BlockSpec((Coutp, Kpad), lambda n, s: (0, 0)),
                pl.BlockSpec((Coutp, 1), lambda n, s: (0, 0)),
            ],
            out_specs=pl.BlockSpec((1, Coutp, tile), lambda n, s: (n, 0, s)),
        ),
        compiler_params=pltpu.CompilerParams(
            dimension_semantics=("parallel", "parallel"),
            vmem_limit_bytes=vmem_limit),
    )(patches, w2, shift2)

    # Already channel-major; slices are no-ops when nothing was padded.
    return out[:, :Cout, :HoWo].reshape(N, Cout, Ho, Wo)


def _reference(x_nchw, weight_oihw, gamma, beta, running_mean, running_var,
               *, stride=1, padding=0, eps=1e-5):
    y = lax.conv_general_dilated(
        x_nchw, weight_oihw,
        window_strides=(stride, stride),
        padding=[(padding, padding), (padding, padding)],
        dimension_numbers=("NCHW", "OIHW", "NCHW"))
    scale = (gamma / jnp.sqrt(running_var + eps)).reshape(1, -1, 1, 1)
    shift = (beta - running_mean * gamma / jnp.sqrt(running_var + eps)
             ).reshape(1, -1, 1, 1)
    return jnp.maximum(y * scale + shift, 0.0)


if __name__ == "__main__":
    # BasicConv(in_planes=4, out_planes=8, kernel_size=3, stride=1, padding=1)
    N, Cin, H, W = 2, 4, 16, 16
    Cout, K, stride, padding = 8, 3, 1, 1

    key = jax.random.PRNGKey(0)
    kx, kw, kg, kb, km, kv = jax.random.split(key, 6)

    x = jax.random.normal(kx, (N, Cin, H, W), dtype=jnp.float32)
    weight = jax.random.normal(kw, (Cout, Cin, K, K), dtype=jnp.float32) * 0.1
    gamma = 1.0 + 0.1 * jax.random.normal(kg, (Cout,), dtype=jnp.float32)
    beta = 0.1 * jax.random.normal(kb, (Cout,), dtype=jnp.float32)
    running_mean = 0.05 * jax.random.normal(km, (Cout,), dtype=jnp.float32)
    running_var = 1.0 + 0.1 * jax.nn.softplus(
        jax.random.normal(kv, (Cout,), dtype=jnp.float32))

    out = basic_conv_pallas(x, weight, gamma, beta, running_mean, running_var,
                            stride=stride, padding=padding)
    out = jax.block_until_ready(out)

    ref = _reference(x, weight, gamma, beta, running_mean, running_var,
                     stride=stride, padding=padding)
    assert out.shape == (N, Cout, H, W), out.shape
    # bf16 MXU operands + bf16 output store (f32 accumulation inside): tolerance
    # covers ~0.5-1% relative rounding vs the pure-f32 reference.
    out_f32 = out.astype(jnp.float32)
    max_err = float(jnp.max(jnp.abs(out_f32 - ref)))
    assert jnp.allclose(out_f32, ref, atol=5e-2, rtol=5e-2), max_err

    print("KERNEL_OK")
</pallas_src>

<mosaic_0001>
module attributes {stable_mosaic.version = 11 : i64} {
  func.func @_basic_conv_kernel(%arg0: i32, %arg1: i32, %arg2: memref<1x48x256xbf16, #tpu.memory_space<vmem>>, %arg3: memref<8x48xbf16, #tpu.memory_space<vmem>>, %arg4: memref<8x1xf32, #tpu.memory_space<vmem>>, %arg5: memref<1x8x256xbf16, #tpu.memory_space<vmem>>) attributes {dimension_semantics = [#tpu.dimension_semantics<parallel>, #tpu.dimension_semantics<parallel>], iteration_bounds = array<i64: 2, 1>, scalar_prefetch = 0 : i64, scratch_operands = 0 : i64, tpu.core_type = #tpu.core_type<tc>, window_params = [{transform_indices = @transform_0, window_bounds = array<i64: 1, 48, 256>}, {pipeline_mode = #tpu.pipeline_mode<synchronous>, transform_indices = @transform_1, window_bounds = array<i64: 8, 48>}, {pipeline_mode = #tpu.pipeline_mode<synchronous>, transform_indices = @transform_2, window_bounds = array<i64: 8, 1>}, {transform_indices = @transform_3, window_bounds = array<i64: 1, 8, 256>}]} {
    %c0 = arith.constant 0 : index
    %c0_0 = arith.constant 0 : index
    %0 = vector.load %arg3[%c0, %c0_0] : memref<8x48xbf16, #tpu.memory_space<vmem>>, vector<8x48xbf16>
    %c0_1 = arith.constant 0 : index
    %c0_2 = arith.constant 0 : index
    %c0_3 = arith.constant 0 : index
    %1 = vector.load %arg2[%c0_1, %c0_2, %c0_3] : memref<1x48x256xbf16, #tpu.memory_space<vmem>>, vector<1x48x256xbf16>
    %2 = vector.shape_cast %1 : vector<1x48x256xbf16> to vector<48x256xbf16>
    %cst = arith.constant dense<0.000000e+00> : vector<8x256xf32>
    %3 = tpu.matmul %0, %2, %cst {dimension_numbers = #tpu.dot_dimension_numbers<[1], [0], [0], [1], [0, 0, 1, 1], [], []>} : vector<8x48xbf16>, vector<48x256xbf16>, vector<8x256xf32> -> vector<8x256xf32>
    %c0_4 = arith.constant 0 : index
    %c0_5 = arith.constant 0 : index
    %4 = vector.load %arg4[%c0_4, %c0_5] : memref<8x1xf32, #tpu.memory_space<vmem>>, vector<8x1xf32>
    %5 = vector.broadcast %4 : vector<8x1xf32> to vector<8x256xf32>
    %6 = arith.addf %3, %5 : vector<8x256xf32>
    %cst_6 = arith.constant 0.000000e+00 : f32
    %7 = vector.broadcast %cst_6 : f32 to vector<8x256xf32>
    %8 = arith.maximumf %6, %7 : vector<8x256xf32>
    %9 = arith.truncf %8 : vector<8x256xf32> to vector<8x256xbf16>
    %c0_7 = arith.constant 0 : index
    %c0_8 = arith.constant 0 : index
    %c0_9 = arith.constant 0 : index
    %10 = vector.load %arg5[%c0_7, %c0_8, %c0_9] : memref<1x8x256xbf16, #tpu.memory_space<vmem>>, vector<1x8x256xbf16>
    %11 = vector.shape_cast %10 : vector<1x8x256xbf16> to vector<8x256xbf16>
    %12 = vector.shape_cast %9 : vector<8x256xbf16> to vector<1x8x256xbf16>
    tpu.vector_store %arg5[%c0_7, %c0_8, %c0_9], %12 {strides = array<i32>} : memref<1x8x256xbf16, #tpu.memory_space<vmem>>, vector<1x8x256xbf16>,
    return
  }
  func.func @transform_0(%arg0: i32, %arg1: i32) -> (i32, i32, i32) {
    %c0_i32 = arith.constant 0 : i32
    %c0_i32_0 = arith.constant 0 : i32
    return %arg0, %c0_i32, %arg1 : i32, i32, i32
  }
  func.func @transform_1(%arg0: i32, %arg1: i32) -> (i32, i32) {
    %c0_i32 = arith.constant 0 : i32
    %c0_i32_0 = arith.constant 0 : i32
    %c0_i32_1 = arith.constant 0 : i32
    return %c0_i32, %c0_i32_0 : i32, i32
  }
  func.func @transform_2(%arg0: i32, %arg1: i32) -> (i32, i32) {
    %c0_i32 = arith.constant 0 : i32
    %c0_i32_0 = arith.constant 0 : i32
    %c0_i32_1 = arith.constant 0 : i32
    return %c0_i32, %c0_i32_0 : i32, i32
  }
  func.func @transform_3(%arg0: i32, %arg1: i32) -> (i32, i32, i32) {
    %c0_i32 = arith.constant 0 : i32
    %c0_i32_0 = arith.constant 0 : i32
    return %arg0, %c0_i32, %arg1 : i32, i32, i32
  }
}

</mosaic_0001>

<bundles_post_ra>
// kernel: tpu_custom_call.1
= control target key start
LH: loop header
LB: loop body
LE: loop exit
PB: predicated region body
PF: predicated region fallthrough
CT: control target
= control target key end

     0   :  { %8 = vsyncpa [#allocation3], 0  ;;  %s829_s0 = inlined_call_operand.hbm [shape: bf16[2,48,256], index: 0, kind: input, shape index: {}]   ;;  %s830_s1 = inlined_call_operand.vmem [shape: bf16[8,48], index: 1, kind: input, shape index: {}]   ;;  %s831_s2 = inlined_call_operand.vmem [shape: f32[8,1], index: 2, kind: input, shape index: {}]   ;;  %s832_s3 = inlined_call_operand.hbm [shape: bf16[2,8,256], index: 3, kind: output, shape index: {}]  }
   0x1   :  { %10 = vsyncpa [#allocation3 + $0x1], 0 }
   0x2   :  { %11 = vsyncpa [#allocation4], 0 }
   0x3   :  { %13 = vsyncpa [#allocation4 + $0x1], 0  ;;  %s649_s12 = smov 0   ;;  %s651_s13 = smov 0  }
   0x4   :  { %s653_s14 = smov 0   ;;  %s655_s15 = smov 0  }
   0x5   :  { %s657_s16 = smov 0   ;;  %s659_s17 = smov 0  }
   0x6 LB: > { %s410_s18 = sadd.s32 4294967295, %s622_s17   ;;  %s411_s19 = sadd.s32 4294967294, %s622_s17   ;;  %s622_s17 = sphi %s659_s17, %s19_s17   ;;  %s618_s16 = sphi %s657_s16, %s847_s16   ;;  %s614_s15 = sphi %s655_s15, %s846_s15   ;;  %s610_s14 = sphi %s653_s14, %s845_s14   ;;  %s606_s13 = sphi %s651_s13, %s844_s13   ;;  %s602_s12 = sphi %s649_s12, %s843_s12  }
   0x7   : > { %s31_s20 = sadd.s32 1, %s618_s16  ;;  %s40_s21 = sadd.s32 1, %s610_s14 }
   0x8   : > { %p33_p0 = scmp.ge.s32.totalorder %s31_s20, 2  ;;  %p47_p1 = scmp.ne.s32.totalorder %s610_s14, %s606_s13 }
   0x9   : > { %p48_p2 = scmp.eq.s32.totalorder %s622_s17, 0  ;;  %p53_p3 = scmp.ne.s32.totalorder %s606_s13, %s602_s12 }
   0xa   : > { %s849_s20 = smov (%p33_p0, %s31_s20), 0  ;;  %p54_p5 = scmp.eq.s32.totalorder %s410_s18, 0 }
   0xb   : > { %p690_p4 = por %p48_p2, %p47_p1  ;;  %s35_s23 = ssub.s32 %s618_s16, %s849_s20 }
   0xc   : > { %p121_p6 = scmp.eq.s32.totalorder %s410_s18, 1  ;;  %p38_p7 = scmp.eq.s32.totalorder %s35_s23, 0 }
   0xd   : > { %p696_p8 = por %p54_p5, %p53_p3  ;;  %p127_p10 = scmp.eq.s32.totalorder %s411_s19, 1 }
   0xe   : > { %p700_p9 = por %p121_p6, %p47_p1  ;;  %p447_p13 = scmp.lt.s32.totalorder %s622_s17, 2 }
   0xf   : > { %s705_s26 = scalar_select %p38_p7, %s610_s14, %s40_s21  }
  0x10   : > { %s836_s25 = scalar_select %p700_p9, 1, 0 }
  0x11   : > { %p707_p11 = por %p127_p10, %p53_p3  ;;  %s153_s28 = sand.u32 1, %s610_s14  }
  0x12   : > { %s432_s29 = smul.u32 48, %s153_s28  ;;  %p717_p0 = pnand %p447_p13, %p690_p4 }
  0x13   : > { %s837_s27 = scalar_select %p707_p11, 1, 0 }
  0x14   : > { %s433_s30 = smul.u32 768, %s618_s16  ;;  %s157_s8 = scalar_lea.vmem [#allocation2], %s432_s29 }
  0x15   : > { %s166_s9 = sshll.u32 %s157_s8, 4  ;;  %s729_s10 = scalar_lea.sflag [#allocation3], %s153_s28  ;;  %s726_s9 = int_to_ptr.vmem [resolvable:$true] %s166_s9 }
  0x16   : > { %s724_s7 = scalar_lea.hbm %s829_s0, %s433_s30  ;;  %p512_p3 = pneg %p717_p0 }
  0x17   : > { %s510_s11 = scalar_lea.hbm %s724_s7, 768  ;;  %s515_s21 = scalar_lea.hbm %s829_s0, 1536 }
  0x18   : > { %p511_p2 = scmp.ne.s32.totalorder %s724_s7, %s510_s11  ;;  %p516_p6 = scmp.lt.u32.totalorder %s724_s7, %s829_s0 }
  0x19   : > { %p517_p7 = scmp.lt.u32.totalorder %s515_s21, %s510_s11  ;;  %p519_p13 = scmp.lt.u32.totalorder %s510_s11, %s724_s7 }
  0x1a   : > { %p513_p4 = pnand %p512_p3, %p511_p2 }
  0x1b   : > { %p518_p10 = por %p517_p7, %p516_p6 }
  0x1c   : > { %p514_p5 = pneg %p513_p4 }
  0x1d   : > { %p520_p12 = por %p519_p13, %p518_p10 }
  0x1f   : > { %p521_p1 = pnand %p520_p12, %p514_p5 }
  0x21   : > { %524 = shalt.err (!%p521_p1)
}
  0x22   : > { %s525_s28 = scalar_lea.vmem %s726_s9, 768  ;;  %s624_s29 = smov [#allocation2]  }
  0x23   : > { %p526_p2 = scmp.ne.s32.totalorder %s726_s9, %s525_s28  ;;  %s530_s30 = sshll.u32 %s624_s29, 4  ;;  %s531_s30 = int_to_ptr.vmem [resolvable:$false] %s530_s30 }
  0x24   : > { %s532_s5 = scalar_lea.vmem %s531_s30, 1536  ;;  %p533_p9 = scmp.lt.s32.totalorder %s726_s9, %s531_s30 }
  0x25   : > { %p528_p4 = pnand %p526_p2, %p512_p3  ;;  %p534_p6 = scmp.lt.s32.totalorder %s532_s5, %s525_s28 }
  0x27   : > { %p529_p11 = pneg %p528_p4  ;;  %p535_p7 = por %p534_p6, %p533_p9 }
  0x29   : > { %p536_p10 = pnand %p535_p7, %p529_p11 }
  0x2b   : > { %539 = shalt.err (!%p536_p10)
}
  0x2c   : > { %s625_s6 = smov 128   ;;  %s626_s8 = smov 8  }
  0x2d   : > { %442 = dma.hbm_to_vmem [thread:$0]  (!%p717_p0), %s724_s7, 768, %s726_s9, %s729_s10, %s625_s6, %s625_s6, %s626_s8  }
  0x2e   : > { %p174_p12 = scmp.lt.s32.totalorder %s622_s17, 3  ;;  %p839_p1 = scmp.ge.s32.totalorder %s622_s17, 1 }
  0x30   : > { %p175_p3 = pnand %p839_p1, %p174_p12 }
  0x31   : > { %s761_s11 = sand.u32 (!%p175_p3), 1, %s606_s13  }
  0x32   : > { %178 = sbr.rel (%p175_p3) target bundleno = 305 (0x131), region = 32  ;;  %s181_s19 = scalar_lea.sflag (!%p175_p3), [#allocation3], %s761_s11 }
  0x33   : > { %s434_s18 = smul.u32 (!%p175_p3), 48, %s761_s11 }
  0x35   : > { %s184_s21 = scalar_lea.vmem (!%p175_p3), [#allocation2], %s434_s18 }
  0x39   : > { %593 = dma.done.wait (%p696_p8), %s181_s19, 768  }
  0x3a   : > { %595 = vsyncadd (%p696_p8), %s181_s19, 4294966528  ;;  %v627_v0 = vmov 0   ;;  %v501_v1 = vld [vmem:[%s184_s21 + $0x4] ss:$8 sps:$4 sm:$0xff]   ;;  %v503_v2 = vld [vmem:[%s184_s21] ss:$8 sps:$4 sm:$0xff]  }
  0x3b   : > { %289 = vmatprep.mubr.bf16.mxu0 %v627_v0  ;;  %500 = vset.pattern.permute.xlu0 %v627_v0  ;;  %v504_v3 = vld [vmem:[%s184_s21 + $0x14] ss:$8 sps:$4 sm:$0xff]   ;;  %v506_v4 = vld [vmem:[%s184_s21 + $0x10] ss:$8 sps:$4 sm:$0xff]   ;;  %v507_v5 = vld [vmem:[%s184_s21 + $0x24] ss:$8 sps:$4 sm:$0xff]  }
  0x3c   : > { %257 = vmatprep.subr.bf16.mxu0 %v501_v1  ;;  %v217_v6 = vld [vmem:[%s831_s2] sm:$0xff]  ;;  %vm253_vm0 = vcmask 392192   ;;  %s416_s10 = sshll.u32 %s761_s11, 3  ;;  %s431_s22 = sshll.u32 %s614_s15, 7 }
  0x3d   : > { %258 = vmatpush1.bf16.msra.mxu0 %v503_v2  ;;  %220 = vperm.xlu0 %500, %v217_v6   ;;  %v509_v7 = vld [vmem:[%s184_s21 + $0x20] ss:$8 sps:$4 sm:$0xff]   ;;  %s206_s23 = scalar_lea.vmem [#allocation5], %s416_s10  ;;  %s780_s5 = scalar_lea.hbm %s832_s3, %s431_s22 }
  0x3e   : > { %259 = vmatprep.subr.bf16.mxu0 %v504_v3  ;;  %v210_v8 = vld [vmem:[%s830_s1] sm:$0xf]  ;;  %s326_s28 = sshll.u32 %s206_s23, 4  ;;  %s310_s6 = scalar_lea.sflag [#allocation4], %s761_s11  ;;  %s782_s28 = int_to_ptr.vmem [resolvable:$true] %s326_s28 }
  0x3f   : > { %s540_s8 = scalar_lea.vmem %s782_s28, 128  ;;  %p840_p9 = scmp.ne.s32.totalorder %s836_s25, 0 }
  0x40   : > { %p541_p8 = scmp.ne.s32.totalorder %s782_s28, %s540_s8  ;;  %s628_s15 = smov [#allocation5]  }
  0x41   : > { %260 = vmatpush1.bf16.msra.mxu0 %v506_v4  ;;  %s544_s18 = sshll.u32 %s628_s15, 4  ;;  %s545_s18 = int_to_ptr.vmem [resolvable:$false] %s544_s18 }
  0x42   : > { %261 = vmatprep.subr.bf16.mxu0 %v507_v5  ;;  %p542_p11 = pnand %p541_p8, %p840_p9  ;;  %s546_s19 = scalar_lea.vmem %s545_s18, 256 }
  0x43   : > { %p547_p5 = scmp.lt.s32.totalorder %s782_s28, %s545_s18  ;;  %p548_p13 = scmp.lt.s32.totalorder %s546_s19, %s540_s8 }
  0x44   : > { %p543_p0 = pneg %p542_p11 }
  0x45   : > { %262 = vmatpush1.bf16.msra.mxu0 %v509_v7  ;;  %p549_p2 = por %p548_p13, %p547_p5 }
  0x47   : > { %p550_p4 = pnand %p549_p2, %p543_p0 }
  0x48   : > { %423 = vmatmul.mubr.msk.bf16.vlgmr.msra.gmra.mrb[0].mxu0 %vm253_vm0, %v210_v8 }
  0xbc   : > { %v221_v9 = vpop.permute.xlu0 %220 }
 0x11b   : > { %v291_v10 = vpop.f32.mrb[0].mxu0 }
 0x11c   : > { %v292_v11 = vadd.f32 %v291_v10, %v221_v9  ;;  %v293_v12 = vpop.f32.mrb[1].mxu0 }
 0x11d   : > { %v294_v13 = vadd.f32 %v293_v12, %v221_v9  ;;  %v295_v14 = vpop.f32.mrb[2].mxu0 }
 0x11e   : > { %v298_v15 = vmax.f32 %v292_v11, 0.0  ;;  %v296_v16 = vpop.f32.mrb[3].mxu0 }
 0x11f   : > { %v299_v17 = vmax.f32 %v294_v13, 0.0 }
 0x121   : > { %v430_v18 = vpack.c.bf16 %v299_v17, %v298_v15 }
 0x123   : > { %308 = vst [vmem:[%s206_s23] sm:$0xff] %v430_v18 }
 0x124   : > { %553 = shalt.err (!%p550_p4)
}
 0x125   : > { %s554_s11 = scalar_lea.hbm %s780_s5, 128  ;;  %s558_s7 = scalar_lea.hbm %s832_s3, 256 }
 0x126   : > { %p555_p6 = scmp.ne.s32.totalorder %s780_s5, %s554_s11  ;;  %p559_p12 = scmp.lt.u32.totalorder %s780_s5, %s832_s3 }
 0x127   : > { %p560_p1 = scmp.lt.u32.totalorder %s558_s7, %s554_s11  ;;  %p562_p8 = scmp.lt.u32.totalorder %s554_s11, %s780_s5 }
 0x128   : > { %p556_p7 = pnand %p555_p6, %p840_p9 }
 0x129   : > { %p561_p3 = por %p560_p1, %p559_p12 }
 0x12a   : > { %p557_p10 = pneg %p556_p7 }
 0x12b   : > { %p563_p11 = por %p562_p8, %p561_p3 }
 0x12d   : > { %p564_p0 = pnand %p563_p11, %p557_p10 }
 0x12f   : > { %567 = shalt.err (!%p564_p0)
}
 0x130   : > { %437 = dma.vmem_to_hbm [thread:$0]  (%p840_p9), %s782_s28, 128, %s780_s5, %s310_s6  }
 0x131 PF: > { %s338_s10 = sand.u32 1, %s602_s12   ;;  %p841_p5 = scmp.ne.s32.totalorder %s837_s27, 0 }
 0x132   : > { %p842_p13 = scmp.ge.s32.totalorder %s622_s17, 2  ;;  %s339_s22 = scalar_lea.sflag [#allocation4], %s338_s10 }
 0x134   : > { %p444_p2 = pnand %p842_p13, %p841_p5 }
 0x136   : > { %597 = dma.done.wait (!%p444_p2), %s339_s22, 128  }
 0x137   : > { %599 = vsyncadd (!%p444_p2), %s339_s22, 4294967168  ;;  %s19_s17 = sadd.s32 1, %s622_s17   ;;  %s843_s12 = smov %s606_s13 }
 0x138   : > { %p16_p4 = scmp.ge.s32.totalorder %s19_s17, 4   ;;  %s844_s13 = smov %s610_s14 }
 0x139   : > { %s845_s14 = smov %s705_s26  ;;  %s846_s15 = smov %s618_s16 }
 0x13a   : > { %s847_s16 = smov %s849_s20  ;;  %18 = sbr.rel (!%p16_p4) target bundleno = 6 (0x6), region = 77 }
 0x141   :  { %344 = vsyncpa [#allocation3], 1 }
 0x142   :  { %346 = vsyncpa [#allocation3 + $0x1], 1 }
 0x143   :  { %347 = vsyncpa [#allocation4], 1 }
 0x144   :  { %349 = vsyncpa [#allocation4 + $0x1], 1 }

</bundles_post_ra>
